<compile_context>
chip_gen: v5e
topology: v5e:2x2
jax: 0.10.0
libtpu: 0.0.40
codegen_flags: <defaults>
</compile_context>

<pallas_src>
import math

import jax
import jax.numpy as jnp
from jax.experimental import pallas as pl
from jax.experimental.pallas import tpu as pltpu


def _round_up(x, m):
    return (x + m - 1) // m * m


def _choose_tiles(n, tm_target, tk_target):
    """Pick (n_padded, tm, tk): power-of-two multiples of 128, bounded padding."""
    n128 = _round_up(n, 128)
    # Contraction (adj column) tile: largest pow2*128 <= min(tk_target, n128)
    # whose padding overhead stays <= 12.5%.
    tk = 128
    while tk * 2 <= min(tk_target, n128):
        tk *= 2
    while tk > 128 and (_round_up(n128, tk) - n128) * 8 > n128:
        tk //= 2
    n_p = _round_up(n128, tk)
    # Output row tile: pow2*128 dividing n_p; keep >= 2 row tiles when possible
    # so the "parallel" grid axis can use both v7x TensorCores.
    tm = 128
    while tm * 2 <= min(tm_target, n_p) and n_p % (tm * 2) == 0:
        tm *= 2
    while tm > 128 and n_p // tm < 2:
        tm //= 2
    return n_p, tm, tk


def _xw_kernel(x_ref, w_ref, s_ref):
    # support row-tile = x row-tile @ W   (W fully VMEM-resident; run once per row tile)
    s_ref[...] = jnp.dot(
        x_ref[...], w_ref[...], preferred_element_type=jnp.float32
    ).astype(s_ref.dtype)


def _make_adj_kernel_resident(tk):
    """out row-tile += adj[i, k-tile] @ support[k-tile, :]; support fully resident."""

    def kernel(adj_ref, s_ref, b_ref, o_ref):
        k = pl.program_id(1)

        @pl.when(k == 0)
        def _init():
            o_ref[...] = jnp.zeros_like(o_ref)

        start = pl.multiple_of(k * tk, 128)
        s_tile = s_ref[pl.ds(start, tk), :]
        # adj streamed in its HBM dtype (usually f32); VPU-cast to the MXU dtype
        # right before the dot (hidden under the DMA-bound loop).
        o_ref[...] += jnp.dot(adj_ref[...].astype(s_tile.dtype), s_tile,
                              preferred_element_type=jnp.float32)

        @pl.when(k == pl.num_programs(1) - 1)
        def _bias():
            o_ref[...] += b_ref[...]

    return kernel


def _adj_kernel_tiled(adj_ref, s_ref, b_ref, o_ref):
    """Fallback: support K-tile is DMA'd per step (used only when resident support
    would not fit the VMEM budget, e.g. very large N on v7x)."""
    k = pl.program_id(1)

    @pl.when(k == 0)
    def _init():
        o_ref[...] = jnp.zeros_like(o_ref)

    o_ref[...] += jnp.dot(adj_ref[...].astype(s_ref.dtype), s_ref[...],
                          preferred_element_type=jnp.float32)

    @pl.when(k == pl.num_programs(1) - 1)
    def _bias():
        o_ref[...] += b_ref[...]


def gcn_forward(x, adj, w, b=None, *, dot_dtype=jnp.bfloat16, tm=512, tk=1024,
                vmem_budget_bytes=40 * 1024 * 1024):
    """GraphConvolution.forward: adj @ (x @ w) + b, as two Pallas TPU kernels.

    x:   [N, nfeat]        adj: [N, N] dense (f32, or already pre-cast to dot_dtype)
    w:   [nfeat, nhid]     b:   [nhid] or None
    dot_dtype: dtype fed to the MXU (bf16 default; accumulation is always f32).
    """
    n, nfeat = x.shape
    nhid = w.shape[1]
    assert adj.shape == (n, n)
    if b is None:
        b = jnp.zeros((nhid,), jnp.float32)

    nfeat_p = _round_up(nfeat, 128)
    nhid_p = _round_up(nhid, 128)
    n_p, tm_, tk_ = _choose_tiles(n, tm, tk)

    # x / W / b are tiny relative to adj: cast + pad them in the wrapper.
    xd = jnp.pad(x.astype(dot_dtype), ((0, n_p - n), (0, nfeat_p - nfeat)))
    wd = jnp.pad(w.astype(dot_dtype), ((0, nfeat_p - nfeat), (0, nhid_p - nhid)))
    bd = jnp.pad(b.astype(jnp.float32), (0, nhid_p - nhid)).reshape(1, nhid_p)
    # adj: NO wrapper dtype cast (kernel casts per-tile); pad only if required.
    adjd = adj if n_p == n else jnp.pad(adj, ((0, n_p - n), (0, n_p - n)))

    sup_it = jnp.dtype(dot_dtype).itemsize
    adj_it = jnp.dtype(adjd.dtype).itemsize

    # ---- 1) support = x @ W : computed exactly once --------------------------
    support = pl.pallas_call(
        _xw_kernel,
        out_shape=jax.ShapeDtypeStruct((n_p, nhid_p), dot_dtype),
        grid_spec=pltpu.PrefetchScalarGridSpec(
            num_scalar_prefetch=0,
            grid=(n_p // tm_,),
            in_specs=[
                pl.BlockSpec((tm_, nfeat_p), lambda i: (i, 0)),      # x row tile
                pl.BlockSpec((nfeat_p, nhid_p), lambda i: (0, 0)),   # full W (resident)
            ],
            out_specs=pl.BlockSpec((tm_, nhid_p), lambda i: (i, 0)),
        ),
        compiler_params=pltpu.CompilerParams(
            dimension_semantics=("parallel",),
            vmem_limit_bytes=32 * 1024 * 1024),
        cost_estimate=pl.CostEstimate(
            flops=2 * n_p * nfeat_p * nhid_p,
            transcendentals=0,
            bytes_accessed=(n_p * nfeat_p + nfeat_p * nhid_p + n_p * nhid_p) * sup_it),
    )(xd, wd)

    # ---- 2) out = adj @ support + bias ---------------------------------------
    # Hold the whole `support` matrix VMEM-resident (single DMA, constant block
    # index) when it fits a conservative budget that also works on v7x's 64 MiB;
    # otherwise fall back to the K-tiled, double-buffered support spec.
    resident_need = (2 * n_p * nhid_p * sup_it      # support (worst case double-buffered)
                     + 2 * tm_ * tk_ * adj_it       # adj tile, double-buffered
                     + 2 * tm_ * nhid_p * 4         # f32 output tile
                     + 2 * nhid_p * 4)              # bias
    use_resident = resident_need <= vmem_budget_bytes

    if use_resident:
        kernel2 = _make_adj_kernel_resident(tk_)
        support_spec = pl.BlockSpec((n_p, nhid_p), lambda i, k: (0, 0))
        sup_bytes = n_p * nhid_p * sup_it
        vmem_need = resident_need
    else:
        kernel2 = _adj_kernel_tiled
        support_spec = pl.BlockSpec((tk_, nhid_p), lambda i, k: (k, 0))
        sup_bytes = (n_p // tm_) * n_p * nhid_p * sup_it
        vmem_need = (2 * tk_ * nhid_p * sup_it
                     + 2 * tm_ * tk_ * adj_it
                     + 2 * tm_ * nhid_p * 4
                     + 2 * nhid_p * 4)

    # Stay well under v7x's 64 MiB physical VMEM; v5e/v6e have 128 MiB so this is safe.
    vmem_limit = min(max(32 * 1024 * 1024, int(vmem_need * 5 // 4)),
                     56 * 1024 * 1024)

    out = pl.pallas_call(
        kernel2,
        out_shape=jax.ShapeDtypeStruct((n_p, nhid_p), jnp.float32),
        grid_spec=pltpu.PrefetchScalarGridSpec(
            num_scalar_prefetch=0,
            grid=(n_p // tm_, n_p // tk_),
            in_specs=[
                pl.BlockSpec((tm_, tk_), lambda i, k: (i, k)),    # adj tile (HBM dtype)
                support_spec,                                      # support
                pl.BlockSpec((1, nhid_p), lambda i, k: (0, 0)),    # bias (resident)
            ],
            out_specs=pl.BlockSpec((tm_, nhid_p), lambda i, k: (i, 0)),
        ),
        compiler_params=pltpu.CompilerParams(
            dimension_semantics=("parallel", "arbitrary"),
            vmem_limit_bytes=vmem_limit),
        cost_estimate=pl.CostEstimate(
            flops=2 * n_p * n_p * nhid_p,
            transcendentals=0,
            bytes_accessed=(n_p * n_p * adj_it
                            + sup_bytes
                            + n_p * nhid_p * 4
                            + nhid_p * 4)),
    )(adjd, support, bd)

    return out[:n, :nhid]


def gcn_reference(x, adj, w, b):
    support = jnp.dot(x, w, precision=jax.lax.Precision.HIGHEST)
    out = jnp.dot(adj, support, precision=jax.lax.Precision.HIGHEST)
    return out + b


if __name__ == "__main__":
    # Small shapes consistent with the module: N nodes, nfeat -> nhid.
    N, NFEAT, NHID = 128, 64, 128

    key = jax.random.PRNGKey(0)
    kx, kadj, kw, kb = jax.random.split(key, 4)

    x = jax.random.normal(kx, (N, NFEAT), dtype=jnp.float32)

    # Row-normalized adjacency with self-loops (dense stand-in for spmm input).
    a_raw = (jax.random.uniform(kadj, (N, N)) < 0.1).astype(jnp.float32)
    adj = a_raw + jnp.eye(N, dtype=jnp.float32)
    adj = adj / jnp.sum(adj, axis=1, keepdims=True)

    # GraphConvolution.reset_parameters: uniform(-stdv, stdv), stdv = 1/sqrt(out_features)
    stdv = 1.0 / math.sqrt(NHID)
    w = jax.random.uniform(kw, (NFEAT, NHID), minval=-stdv, maxval=stdv,
                           dtype=jnp.float32)
    b = jax.random.uniform(kb, (NHID,), minval=-stdv, maxval=stdv,
                           dtype=jnp.float32)

    ref = gcn_reference(x, adj, w, b)

    # Default fast path: f32 adj streamed + in-kernel bf16 cast, resident support.
    out = jax.block_until_ready(gcn_forward(x, adj, w, b))
    assert out.shape == (N, NHID)
    assert jnp.max(jnp.abs(out - ref)) < 3e-2, "bf16 path mismatch vs reference"

    # f32 path (bit-accurate mode) sanity check of the kernel structure.
    out_f32 = jax.block_until_ready(gcn_forward(x, adj, w, b, dot_dtype=jnp.float32))
    assert jnp.max(jnp.abs(out_f32 - ref)) < 2e-3, "f32 path mismatch vs reference"

    # Force the K-tiled support fallback (large-N / tight-VMEM path) to make sure
    # both kernel variants compile and run.
    out_fb = jax.block_until_ready(gcn_forward(x, adj, w, b, vmem_budget_bytes=1))
    assert jnp.max(jnp.abs(out_fb - ref)) < 3e-2, "fallback path mismatch vs reference"

    # Pre-cast adj (amortized-reuse mode): kernel accepts bf16 adj directly.
    out_pc = jax.block_until_ready(gcn_forward(x, adj.astype(jnp.bfloat16), w, b))
    assert jnp.max(jnp.abs(out_pc - ref)) < 3e-2, "pre-cast adj path mismatch vs reference"

    print("KERNEL_OK")
</pallas_src>

<mosaic_0001>
module attributes {stable_mosaic.version = 11 : i64} {
  func.func @_xw_kernel(%arg0: i32, %arg1: memref<128x128xbf16, #tpu.memory_space<vmem>>, %arg2: memref<128x128xbf16, #tpu.memory_space<vmem>>, %arg3: memref<128x128xbf16, #tpu.memory_space<vmem>>) attributes {dimension_semantics = [#tpu.dimension_semantics<parallel>], iteration_bounds = array<i64: 1>, scalar_prefetch = 0 : i64, scratch_operands = 0 : i64, tpu.core_type = #tpu.core_type<tc>, window_params = [{transform_indices = @transform_0, window_bounds = array<i64: 128, 128>}, {pipeline_mode = #tpu.pipeline_mode<synchronous>, transform_indices = @transform_1, window_bounds = array<i64: 128, 128>}, {transform_indices = @transform_2, window_bounds = array<i64: 128, 128>}]} {
    %c0 = arith.constant 0 : index
    %c0_0 = arith.constant 0 : index
    %0 = vector.load %arg1[%c0, %c0_0] : memref<128x128xbf16, #tpu.memory_space<vmem>>, vector<128x128xbf16>
    %c0_1 = arith.constant 0 : index
    %c0_2 = arith.constant 0 : index
    %1 = vector.load %arg2[%c0_1, %c0_2] : memref<128x128xbf16, #tpu.memory_space<vmem>>, vector<128x128xbf16>
    %cst = arith.constant dense<0.000000e+00> : vector<128x128xf32>
    %2 = tpu.matmul %0, %1, %cst {dimension_numbers = #tpu.dot_dimension_numbers<[1], [0], [0], [1], [0, 0, 1, 1], [], []>} : vector<128x128xbf16>, vector<128x128xbf16>, vector<128x128xf32> -> vector<128x128xf32>
    %3 = arith.truncf %2 : vector<128x128xf32> to vector<128x128xbf16>
    %c0_3 = arith.constant 0 : index
    %c0_4 = arith.constant 0 : index
    %4 = vector.load %arg3[%c0_3, %c0_4] : memref<128x128xbf16, #tpu.memory_space<vmem>>, vector<128x128xbf16>
    tpu.vector_store %arg3[%c0_3, %c0_4], %3 {strides = array<i32>} : memref<128x128xbf16, #tpu.memory_space<vmem>>, vector<128x128xbf16>,
    return
  }
  func.func @transform_0(%arg0: i32) -> (i32, i32) {
    %c0_i32 = arith.constant 0 : i32
    %c0_i32_0 = arith.constant 0 : i32
    return %arg0, %c0_i32 : i32, i32
  }
  func.func @transform_1(%arg0: i32) -> (i32, i32) {
    %c0_i32 = arith.constant 0 : i32
    %c0_i32_0 = arith.constant 0 : i32
    %c0_i32_1 = arith.constant 0 : i32
    return %c0_i32, %c0_i32_0 : i32, i32
  }
  func.func @transform_2(%arg0: i32) -> (i32, i32) {
    %c0_i32 = arith.constant 0 : i32
    %c0_i32_0 = arith.constant 0 : i32
    return %arg0, %c0_i32 : i32, i32
  }
}

</mosaic_0001>

<bundles_post_ra>
// kernel: tpu_custom_call.1
= control target key start
LH: loop header
LB: loop body
LE: loop exit
PB: predicated region body
PF: predicated region fallthrough
CT: control target
= control target key end

     0   :  { %7 = vsyncpa [#allocation3], 0  ;;  %s545_s0 = inlined_call_operand.hbm [shape: bf16[128,128], index: 0, kind: input, shape index: {}]   ;;  %s546_s1 = inlined_call_operand.hbm [shape: bf16[128,128], index: 1, kind: input, shape index: {}]   ;;  %s547_s2 = inlined_call_operand.hbm [shape: bf16[128,128], index: 2, kind: output, shape index: {}]  }
   0x1   :  { %8 = vsyncpa [#allocation6], 0 }
   0x2   :  { %9 = vsyncpa [#allocation4], 0  ;;  %s14_s11 = sshll.u32 %s545_s0, 4  ;;  %s507_s12 = smov [#allocation2]   ;;  %s15_s11 = int_to_ptr.hbm [resolvable:$true] %s14_s11 }
   0x3   :  { %s16_s13 = sshll.u32 %s507_s12, 4  ;;  %s27_s16 = sshll.u32 %s546_s1, 4  ;;  %s17_s13 = int_to_ptr.vmem [resolvable:$true] %s16_s13  ;;  %s28_s16 = int_to_ptr.hbm [resolvable:$true] %s27_s16 }
   0x4   :  { %s508_s17 = smov 64   ;;  %s509_s18 = smov 4  }
   0x5   :  { %22 = dma.hbm_to_vmem [thread:$0]  %s15_s11, 1024, %s17_s13, [#allocation3], %s508_s17, %s508_s17, %s509_s18  }
   0x6   :  { %s510_s19 = smov [#allocation5]  }
   0x7   :  { %s29_s20 = sshll.u32 %s510_s19, 4  ;;  %s30_s20 = int_to_ptr.vmem [resolvable:$true] %s29_s20 }
   0x8   :  { %35 = dma.hbm_to_vmem [thread:$0]  %s28_s16, 1024, %s30_s20, [#allocation6], %s508_s17, %s508_s17, %s509_s18  }
   0x9   :  { %501 = dma.done.wait [#allocation3], 1024  }
   0xa   :  { %502 = vsyncadd [#allocation3], 4294966272 }
   0xb   :  { %503 = dma.done.wait [#allocation6], 1024  }
   0xc   :  { %504 = vsyncadd [#allocation6], 4294966272  ;;  %v352_v0 = vld [vmem:[#allocation5 + $0x38] sm:$0xff]  ;;  %v351_v1 = vld [vmem:[#allocation5 + $0x30] sm:$0xff]  ;;  %s511_s0 = smov [#allocation7]   ;;  %s259_s23 = sshll.u32 %s547_s2, 4  ;;  %s260_s23 = int_to_ptr.hbm [resolvable:$true] %s259_s23 }
   0xd   :  { %172 = vmatpush.bf16.msra.mxu0 %v352_v0  ;;  %400 = vmatpush.bf16.msra.mxu1 %v352_v0  ;;  %v350_v2 = vld [vmem:[#allocation5 + $0x28] sm:$0xff]  ;;  %v349_v3 = vld [vmem:[#allocation5 + $0x20] sm:$0xff]  ;;  %v348_v4 = vld [vmem:[#allocation5 + $0x18] sm:$0xff]  ;;  %s257_s1 = sshll.u32 %s511_s0, 4  ;;  %s258_s1 = int_to_ptr.vmem [resolvable:$true] %s257_s1 }
   0xe   :  { %401 = vmatpush.bf16.msra.mxu2 %v352_v0  ;;  %402 = vmatpush.bf16.msra.mxu3 %v352_v0  ;;  %v347_v5 = vld [vmem:[#allocation5 + $0x10] sm:$0xff]  ;;  %v346_v6 = vld [vmem:[#allocation5 + $0x8] sm:$0xff]  ;;  %v345_v7 = vld [vmem:[#allocation5] sm:$0xff] }
   0xf   :  { %v337_v8 = vld [vmem:[#allocation2] sm:$0xff]  ;;  %v339_v9 = vld [vmem:[#allocation2 + $0x10] sm:$0xff]  ;;  %v338_v12 = vld [vmem:[#allocation2 + $0x8] sm:$0xff] }
  0x10   :  { %v341_v10 = vld [vmem:[#allocation2 + $0x20] sm:$0xff]  ;;  %v343_v11 = vld [vmem:[#allocation2 + $0x30] sm:$0xff]  ;;  %v340_v13 = vld [vmem:[#allocation2 + $0x18] sm:$0xff] }
  0x11   :  { %173 = vmatpush.bf16.msra.mxu0 %v351_v1  ;;  %403 = vmatpush.bf16.msra.mxu1 %v351_v1  ;;  %v342_v14 = vld [vmem:[#allocation2 + $0x28] sm:$0xff]  ;;  %v344_v15 = vld [vmem:[#allocation2 + $0x38] sm:$0xff] }
  0x12   :  { %404 = vmatpush.bf16.msra.mxu2 %v351_v1  ;;  %405 = vmatpush.bf16.msra.mxu3 %v351_v1 }
  0x15   :  { %174 = vmatpush.bf16.msra.mxu0 %v350_v2  ;;  %406 = vmatpush.bf16.msra.mxu1 %v350_v2 }
  0x16   :  { %407 = vmatpush.bf16.msra.mxu2 %v350_v2  ;;  %408 = vmatpush.bf16.msra.mxu3 %v350_v2 }
  0x19   :  { %175 = vmatpush.bf16.msra.mxu0 %v349_v3  ;;  %409 = vmatpush.bf16.msra.mxu1 %v349_v3 }
  0x1a   :  { %410 = vmatpush.bf16.msra.mxu2 %v349_v3  ;;  %411 = vmatpush.bf16.msra.mxu3 %v349_v3 }
  0x1d   :  { %176 = vmatpush.bf16.msra.mxu0 %v348_v4  ;;  %412 = vmatpush.bf16.msra.mxu1 %v348_v4 }
  0x1e   :  { %413 = vmatpush.bf16.msra.mxu2 %v348_v4  ;;  %414 = vmatpush.bf16.msra.mxu3 %v348_v4 }
  0x21   :  { %177 = vmatpush.bf16.msra.mxu0 %v347_v5  ;;  %415 = vmatpush.bf16.msra.mxu1 %v347_v5 }
  0x22   :  { %416 = vmatpush.bf16.msra.mxu2 %v347_v5  ;;  %417 = vmatpush.bf16.msra.mxu3 %v347_v5 }
  0x25   :  { %178 = vmatpush.bf16.msra.mxu0 %v346_v6  ;;  %418 = vmatpush.bf16.msra.mxu1 %v346_v6 }
  0x26   :  { %419 = vmatpush.bf16.msra.mxu2 %v346_v6  ;;  %420 = vmatpush.bf16.msra.mxu3 %v346_v6 }
  0x29   :  { %179 = vmatpush.bf16.msra.mxu0 %v345_v7  ;;  %421 = vmatpush.bf16.msra.mxu1 %v345_v7 }
  0x2a   :  { %422 = vmatpush.bf16.msra.mxu2 %v345_v7  ;;  %423 = vmatpush.bf16.msra.mxu3 %v345_v7 }
  0x2c   :  { %180 = vmatmul.bf16.vlgmr.msra.gmra.mxu0 %v337_v8  ;;  %190 = vmatmul.bf16.vlgmr.msra.gmra.mxu1 %v339_v9 }
  0x2d   :  { %200 = vmatmul.bf16.vlgmr.msra.gmra.mxu2 %v341_v10  ;;  %210 = vmatmul.bf16.vlgmr.msra.gmra.mxu3 %v343_v11 }
  0x3c   :  { %185 = vmatmul.bf16.gmra.mxu0 %v338_v12  ;;  %195 = vmatmul.bf16.gmra.mxu1 %v340_v13 }
  0x3d   :  { %205 = vmatmul.bf16.gmra.mxu2 %v342_v14  ;;  %215 = vmatmul.bf16.gmra.mxu3 %v344_v15 }
  0xa9   :  { %v181_v16 = vpop.f32.mrf.mxu0  ;;  %v191_v17 = vpop.f32.mrf.mxu1 }
  0xb0   :  { %v201_v18 = vpop.f32.mrf.mxu2  ;;  %v211_v19 = vpop.f32.mrf.mxu3 }
  0xb1   :  { %v183_v20 = vpop.f32.mrf.mxu0  ;;  %v193_v21 = vpop.f32.mrf.mxu1 }
  0xb2   :  { %v356_v22 = vpack.c.bf16 %v183_v20, %v181_v16  ;;  %v366_v23 = vpack.c.bf16 %v193_v21, %v191_v17 }
  0xb4   :  { %357 = vst [vmem:[#allocation7] sm:$0xff] %v356_v22  }
  0xb5   :  { %394 = vst [vmem:[#allocation7 + $0x10] sm:$0xff] %v366_v23  }
  0xb8   :  { %v203_v24 = vpop.f32.mrf.mxu2  ;;  %v213_v25 = vpop.f32.mrf.mxu3 }
  0xb9   :  { %v376_v26 = vpack.c.bf16 %v203_v24, %v201_v18  ;;  %v386_v27 = vpack.c.bf16 %v213_v25, %v211_v19  ;;  %v186_v28 = vpop.f32.mrf.mxu0  ;;  %v196_v29 = vpop.f32.mrf.mxu1 }
  0xbb   :  { %396 = vst [vmem:[#allocation7 + $0x20] sm:$0xff] %v376_v26  }
  0xbc   :  { %398 = vst [vmem:[#allocation7 + $0x30] sm:$0xff] %v386_v27  }
  0xc0   :  { %v206_v30 = vpop.f32.mrf.mxu2  ;;  %v216_v31 = vpop.f32.mrf.mxu3 }
  0xc1   :  { %v188_v32 = vpop.f32.mrf.mxu0  ;;  %v198_v33 = vpop.f32.mrf.mxu1 }
  0xc2   :  { %v361_v34 = vpack.c.bf16 %v188_v32, %v186_v28  ;;  %v371_v35 = vpack.c.bf16 %v198_v33, %v196_v29 }
  0xc4   :  { %393 = vst [vmem:[#allocation7 + $0x8] sm:$0xff] %v361_v34  }
  0xc5   :  { %395 = vst [vmem:[#allocation7 + $0x18] sm:$0xff] %v371_v35  }
  0xc8   :  { %v208_v36 = vpop.f32.mrf.mxu2  ;;  %v218_v37 = vpop.f32.mrf.mxu3 }
  0xc9   :  { %v381_v38 = vpack.c.bf16 %v208_v36, %v206_v30  ;;  %v391_v39 = vpack.c.bf16 %v218_v37, %v216_v31 }
  0xcb   :  { %397 = vst [vmem:[#allocation7 + $0x28] sm:$0xff] %v381_v38  }
  0xcc   :  { %399 = vst [vmem:[#allocation7 + $0x38] sm:$0xff] %v391_v39  }
  0xcd   :  { %265 = dma.vmem_to_hbm [thread:$0]  %s258_s1, 1024, %s260_s23, [#allocation4], %s508_s17, %s508_s17, %s509_s18  }
  0xce   :  { %505 = dma.done.wait [#allocation4], 1024  }
  0xcf   :  { %506 = vsyncadd [#allocation4], 4294966272 }
  0xd0   :  { %270 = vsyncpa [#allocation3], 1 }
  0xd1   :  { %271 = vsyncpa [#allocation6], 1 }
  0xd2   :  { %272 = vsyncpa [#allocation4], 1 }

</bundles_post_ra>
